<compile_context>
chip_gen: v5e
topology: v5e:2x2
jax: 0.10.0
libtpu: 0.0.40
codegen_flags: <defaults>
</compile_context>

<pallas_src>
import math
import jax
import jax.numpy as jnp
from jax.experimental import pallas as pl
from jax.experimental.pallas import tpu as pltpu


def _round_up(n, m):
    return ((n + m - 1) // m) * m


def _vmem_capacity_bytes():
    """Physical per-core VMEM; conservative default if query is unavailable."""
    try:
        return int(pltpu.get_tpu_info().vmem_capacity_bytes)
    except Exception:
        return 64 << 20  # v7x per-TensorCore VMEM (smallest of the fleet)


def mlp_kernel(x_ref, w1_ref, b1_ref, w2_ref, b2_ref, w3_ref, b3_ref,
               o_ref, h1_ref, h2_ref):
    # Layer 1: Linear + ReLU (bf16 MXU operands, f32 accumulation + epilogue)
    x_bf = x_ref[...].astype(jnp.bfloat16)
    h1 = jnp.dot(x_bf, w1_ref[...], preferred_element_type=jnp.float32)
    h1_ref[...] = jnp.maximum(h1 + b1_ref[...], 0.0)
    # Layer 2: Linear + ReLU
    h2 = jnp.dot(h1_ref[...].astype(jnp.bfloat16), w2_ref[...],
                 preferred_element_type=jnp.float32)
    h2_ref[...] = jnp.maximum(h2 + b2_ref[...], 0.0)
    # Layer 3 (output layer): Linear only, no activation
    h3 = jnp.dot(h2_ref[...].astype(jnp.bfloat16), w3_ref[...],
                 preferred_element_type=jnp.float32)
    o_ref[...] = (h3 + b3_ref[...]).astype(o_ref.dtype)


def prepare_mlp_params(params):
    """One-time prep: lane-pad feature dims to multiples of 128 and cast
    weights to bf16 (biases stay f32).  Zero padding is exact for
    matmul+bias+ReLU.  Returns (prepared_params, logical_dims)."""
    prepared, dims = [], []
    for w, b in params:                     # w: (in, out) f32, b: (1, out) f32
        din, dout = w.shape
        din_p, dout_p = _round_up(din, 128), _round_up(dout, 128)
        wp = jnp.zeros((din_p, dout_p), jnp.bfloat16).at[:din, :dout].set(
            w.astype(jnp.bfloat16))
        bp = jnp.zeros((1, dout_p), jnp.float32).at[:, :dout].set(
            b.astype(jnp.float32))
        prepared.append((wp, bp))
        dims.append((din, dout))
    return prepared, dims


def mlp_forward(x, prepared_params, logical_dims, batch_tile_max=1024):
    """x: (B, input_dim) float32; prepared_params from prepare_mlp_params."""
    (w1, b1), (w2, b2), (w3, b3) = prepared_params
    din = logical_dims[0][0]
    dout = logical_dims[-1][1]
    din_p, d1_p = w1.shape
    d2_p = w2.shape[1]
    dout_p = w3.shape[1]
    B = x.shape[0]

    f32, bf16 = 4, 2
    weight_bytes = (din_p * d1_p + d1_p * d2_p + d2_p * dout_p) * bf16
    bias_bytes = (d1_p + d2_p + dout_p) * f32
    # Per-batch-row VMEM cost: double-buffered x/out f32 tiles, f32 h1/h2
    # scratch, and transient bf16 copies fed to the MXU.
    per_row_bytes = (f32 * (2 * din_p + 2 * dout_p)
                     + f32 * (d1_p + d2_p)
                     + bf16 * (din_p + d1_p + d2_p))

    vmem_cap = _vmem_capacity_bytes()
    vmem_budget = int(vmem_cap * 0.85)
    # Guard the all-weights-resident design against VMEM OOM (v7x hits this
    # first).  TODO(synk): for very large hidden dims, fall back to a
    # hidden-dim grid axis ('arbitrary') with a VMEM accumulator, or split
    # into three M/N/K-tiled pallas_calls instead of raising.
    if 2 * (weight_bytes + bias_bytes) + 16 * per_row_bytes > vmem_budget:
        raise ValueError(
            "MLP weights too large to hold VMEM-resident on this TPU "
            "generation; K/N-tiled fallback not implemented.")

    # --- batch tile: multiple of 16 (bf16 sublane packing), fits VMEM budget,
    #     and >= 2 grid steps when possible so the 'parallel' axis can be
    #     megacore-sharded on v7x. ---
    B16 = _round_up(B, 16)
    tile_budget = vmem_budget - 2 * (weight_bytes + bias_bytes)
    TB = min(_round_up(max(batch_tile_max, 16), 16), B16)
    while TB > 16 and TB * per_row_bytes > tile_budget:
        TB -= 16
    TB = max(TB, 16)
    if B16 >= 32 and B16 <= TB:
        TB = _round_up(B16 // 2, 16)
    B_p = _round_up(B, TB)
    n_tiles = B_p // TB

    # --- pad x only if needed (skip when already aligned) ---
    if B_p == B and din_p == din:
        xp = x
    else:
        xp = jnp.zeros((B_p, din_p), x.dtype).at[:B, :din].set(x)

    # --- scoped VMEM limit: sized from the actual footprint, capped at 85%
    #     of this chip's physical VMEM. ---
    needed = 2 * (weight_bytes + bias_bytes) + TB * per_row_bytes
    vmem_limit = min(vmem_budget, max(int(needed * 1.5) + (4 << 20), 16 << 20))

    cost = pl.CostEstimate(
        flops=2 * B_p * (din_p * d1_p + d1_p * d2_p + d2_p * dout_p),
        transcendentals=0,
        bytes_accessed=(weight_bytes + bias_bytes
                        + B_p * din_p * f32 + B_p * dout_p * f32),
    )

    def build(single_buffer_weights):
        # Weights/biases have constant index_maps -> VMEM-resident across grid
        # steps; request a single buffer for them so they don't cost 2x VMEM.
        w_kw = ({"pipeline_mode": pl.Buffered(1)}
                if single_buffer_weights else {})
        in_specs = [
            pl.BlockSpec((TB, din_p), lambda i: (i, 0)),           # x tile
            pl.BlockSpec((din_p, d1_p), lambda i: (0, 0), **w_kw),
            pl.BlockSpec((1, d1_p), lambda i: (0, 0), **w_kw),
            pl.BlockSpec((d1_p, d2_p), lambda i: (0, 0), **w_kw),
            pl.BlockSpec((1, d2_p), lambda i: (0, 0), **w_kw),
            pl.BlockSpec((d2_p, dout_p), lambda i: (0, 0), **w_kw),
            pl.BlockSpec((1, dout_p), lambda i: (0, 0), **w_kw),
        ]
        return pl.pallas_call(
            mlp_kernel,
            out_shape=jax.ShapeDtypeStruct((B_p, dout_p), jnp.float32),
            grid=(n_tiles,),
            in_specs=in_specs,
            out_specs=pl.BlockSpec((TB, dout_p), lambda i: (i, 0)),
            scratch_shapes=[pltpu.VMEM((TB, d1_p), jnp.float32),
                            pltpu.VMEM((TB, d2_p), jnp.float32)],
            compiler_params=pltpu.CompilerParams(
                dimension_semantics=("parallel",),   # megacore sharding (v7x)
                vmem_limit_bytes=vmem_limit,
            ),
            cost_estimate=cost,
        )

    try:
        out_p = build(True)(xp, w1, b1, w2, b2, w3, b3)
    except Exception:
        # JAX versions without per-BlockSpec Buffered(1): default buffering.
        out_p = build(False)(xp, w1, b1, w2, b2, w3, b3)

    if B_p == B and dout_p == dout:
        return out_p
    return out_p[:B, :dout]


def init_mlp_params(key, input_dim, output_dim, num_hidden_lyr=2):
    """Replicates MLP.__init__ (bn=False, relu): hidden_channels default
    [input_dim]*num_hidden_lyr, xavier_normal_(gain=calculate_gain('relu')),
    PyTorch default bias init.  Weights stored transposed as (in, out)."""
    layer_channels = [input_dim] + [input_dim] * num_hidden_lyr + [output_dim]
    gain = math.sqrt(2.0)  # nn.init.calculate_gain('relu')
    params = []
    for i in range(len(layer_channels) - 1):
        fan_in, fan_out = layer_channels[i], layer_channels[i + 1]
        key, kw, kb = jax.random.split(key, 3)
        std = gain * math.sqrt(2.0 / (fan_in + fan_out))
        w_t = std * jax.random.normal(kw, (fan_in, fan_out), dtype=jnp.float32)
        bound = 1.0 / math.sqrt(fan_in)
        b = jax.random.uniform(kb, (1, fan_out), dtype=jnp.float32,
                               minval=-bound, maxval=bound)
        params.append((w_t, b))
    return params


if __name__ == "__main__":
    key = jax.random.PRNGKey(0)
    batch, input_dim, output_dim = 8, 32, 16

    kx, kp = jax.random.split(key)
    x = jax.random.normal(kx, (batch, input_dim), dtype=jnp.float32)
    params = init_mlp_params(kp, input_dim, output_dim, num_hidden_lyr=2)

    prepared, dims = prepare_mlp_params(params)   # one-time param prep
    out = mlp_forward(x, prepared, dims)
    jax.block_until_ready(out)

    # Pure-JAX reference with the same bf16-operand / f32-accumulate math.
    ref = x
    for i, (w, b) in enumerate(params):
        ref = jnp.dot(ref.astype(jnp.bfloat16), w.astype(jnp.bfloat16),
                      preferred_element_type=jnp.float32) + b
        if i < len(params) - 1:
            ref = jnp.maximum(ref, 0.0)

    assert out.shape == (batch, output_dim)
    assert jnp.allclose(out, ref, atol=2e-3, rtol=2e-3)

    print("KERNEL_OK")
</pallas_src>

<mosaic_0001>
module attributes {stable_mosaic.version = 11 : i64} {
  func.func @mlp_kernel(%arg0: i32, %arg1: memref<16x128xf32, #tpu.memory_space<vmem>>, %arg2: memref<128x128xbf16, #tpu.memory_space<vmem>>, %arg3: memref<1x128xf32, #tpu.memory_space<vmem>>, %arg4: memref<128x128xbf16, #tpu.memory_space<vmem>>, %arg5: memref<1x128xf32, #tpu.memory_space<vmem>>, %arg6: memref<128x128xbf16, #tpu.memory_space<vmem>>, %arg7: memref<1x128xf32, #tpu.memory_space<vmem>>, %arg8: memref<16x128xf32, #tpu.memory_space<vmem>>, %arg9: memref<16x128xf32, #tpu.memory_space<vmem>>, %arg10: memref<16x128xf32, #tpu.memory_space<vmem>>) attributes {dimension_semantics = [#tpu.dimension_semantics<parallel>], iteration_bounds = array<i64: 1>, scalar_prefetch = 0 : i64, scratch_operands = 2 : i64, tpu.core_type = #tpu.core_type<tc>, window_params = [{transform_indices = @transform_0, window_bounds = array<i64: 16, 128>}, {pipeline_mode = #tpu.pipeline_mode<synchronous>, transform_indices = @transform_1, window_bounds = array<i64: 128, 128>}, {pipeline_mode = #tpu.pipeline_mode<synchronous>, transform_indices = @transform_2, window_bounds = array<i64: 1, 128>}, {pipeline_mode = #tpu.pipeline_mode<synchronous>, transform_indices = @transform_3, window_bounds = array<i64: 128, 128>}, {pipeline_mode = #tpu.pipeline_mode<synchronous>, transform_indices = @transform_4, window_bounds = array<i64: 1, 128>}, {pipeline_mode = #tpu.pipeline_mode<synchronous>, transform_indices = @transform_5, window_bounds = array<i64: 128, 128>}, {pipeline_mode = #tpu.pipeline_mode<synchronous>, transform_indices = @transform_6, window_bounds = array<i64: 1, 128>}, {transform_indices = @transform_7, window_bounds = array<i64: 16, 128>}]} {
    %c0 = arith.constant 0 : index
    %c0_0 = arith.constant 0 : index
    %0 = vector.load %arg1[%c0, %c0_0] : memref<16x128xf32, #tpu.memory_space<vmem>>, vector<16x128xf32>
    %1 = arith.truncf %0 : vector<16x128xf32> to vector<16x128xbf16>
    %c0_1 = arith.constant 0 : index
    %c0_2 = arith.constant 0 : index
    %2 = vector.load %arg2[%c0_1, %c0_2] : memref<128x128xbf16, #tpu.memory_space<vmem>>, vector<128x128xbf16>
    %cst = arith.constant dense<0.000000e+00> : vector<16x128xf32>
    %3 = tpu.matmul %1, %2, %cst {dimension_numbers = #tpu.dot_dimension_numbers<[1], [0], [0], [1], [0, 0, 1, 1], [], []>} : vector<16x128xbf16>, vector<128x128xbf16>, vector<16x128xf32> -> vector<16x128xf32>
    %c0_3 = arith.constant 0 : index
    %c0_4 = arith.constant 0 : index
    %4 = vector.load %arg3[%c0_3, %c0_4] : memref<1x128xf32, #tpu.memory_space<vmem>>, vector<1x128xf32>
    %5 = vector.broadcast %4 : vector<1x128xf32> to vector<16x128xf32>
    %6 = arith.addf %3, %5 : vector<16x128xf32>
    %cst_5 = arith.constant 0.000000e+00 : f32
    %7 = vector.broadcast %cst_5 : f32 to vector<16x128xf32>
    %8 = arith.maximumf %6, %7 : vector<16x128xf32>
    %c0_6 = arith.constant 0 : index
    %c0_7 = arith.constant 0 : index
    %9 = vector.load %arg9[%c0_6, %c0_7] : memref<16x128xf32, #tpu.memory_space<vmem>>, vector<16x128xf32>
    tpu.vector_store %arg9[%c0_6, %c0_7], %8 {strides = array<i32>} : memref<16x128xf32, #tpu.memory_space<vmem>>, vector<16x128xf32>,
    %c0_8 = arith.constant 0 : index
    %c0_9 = arith.constant 0 : index
    %10 = vector.load %arg9[%c0_8, %c0_9] : memref<16x128xf32, #tpu.memory_space<vmem>>, vector<16x128xf32>
    %11 = arith.truncf %10 : vector<16x128xf32> to vector<16x128xbf16>
    %c0_10 = arith.constant 0 : index
    %c0_11 = arith.constant 0 : index
    %12 = vector.load %arg4[%c0_10, %c0_11] : memref<128x128xbf16, #tpu.memory_space<vmem>>, vector<128x128xbf16>
    %cst_12 = arith.constant dense<0.000000e+00> : vector<16x128xf32>
    %13 = tpu.matmul %11, %12, %cst_12 {dimension_numbers = #tpu.dot_dimension_numbers<[1], [0], [0], [1], [0, 0, 1, 1], [], []>} : vector<16x128xbf16>, vector<128x128xbf16>, vector<16x128xf32> -> vector<16x128xf32>
    %c0_13 = arith.constant 0 : index
    %c0_14 = arith.constant 0 : index
    %14 = vector.load %arg5[%c0_13, %c0_14] : memref<1x128xf32, #tpu.memory_space<vmem>>, vector<1x128xf32>
    %15 = vector.broadcast %14 : vector<1x128xf32> to vector<16x128xf32>
    %16 = arith.addf %13, %15 : vector<16x128xf32>
    %cst_15 = arith.constant 0.000000e+00 : f32
    %17 = vector.broadcast %cst_15 : f32 to vector<16x128xf32>
    %18 = arith.maximumf %16, %17 : vector<16x128xf32>
    %c0_16 = arith.constant 0 : index
    %c0_17 = arith.constant 0 : index
    %19 = vector.load %arg10[%c0_16, %c0_17] : memref<16x128xf32, #tpu.memory_space<vmem>>, vector<16x128xf32>
    tpu.vector_store %arg10[%c0_16, %c0_17], %18 {strides = array<i32>} : memref<16x128xf32, #tpu.memory_space<vmem>>, vector<16x128xf32>,
    %c0_18 = arith.constant 0 : index
    %c0_19 = arith.constant 0 : index
    %20 = vector.load %arg10[%c0_18, %c0_19] : memref<16x128xf32, #tpu.memory_space<vmem>>, vector<16x128xf32>
    %21 = arith.truncf %20 : vector<16x128xf32> to vector<16x128xbf16>
    %c0_20 = arith.constant 0 : index
    %c0_21 = arith.constant 0 : index
    %22 = vector.load %arg6[%c0_20, %c0_21] : memref<128x128xbf16, #tpu.memory_space<vmem>>, vector<128x128xbf16>
    %cst_22 = arith.constant dense<0.000000e+00> : vector<16x128xf32>
    %23 = tpu.matmul %21, %22, %cst_22 {dimension_numbers = #tpu.dot_dimension_numbers<[1], [0], [0], [1], [0, 0, 1, 1], [], []>} : vector<16x128xbf16>, vector<128x128xbf16>, vector<16x128xf32> -> vector<16x128xf32>
    %c0_23 = arith.constant 0 : index
    %c0_24 = arith.constant 0 : index
    %24 = vector.load %arg7[%c0_23, %c0_24] : memref<1x128xf32, #tpu.memory_space<vmem>>, vector<1x128xf32>
    %25 = vector.broadcast %24 : vector<1x128xf32> to vector<16x128xf32>
    %26 = arith.addf %23, %25 : vector<16x128xf32>
    %c0_25 = arith.constant 0 : index
    %c0_26 = arith.constant 0 : index
    %27 = vector.load %arg8[%c0_25, %c0_26] : memref<16x128xf32, #tpu.memory_space<vmem>>, vector<16x128xf32>
    tpu.vector_store %arg8[%c0_25, %c0_26], %26 {strides = array<i32>} : memref<16x128xf32, #tpu.memory_space<vmem>>, vector<16x128xf32>,
    return
  }
  func.func @transform_0(%arg0: i32) -> (i32, i32) {
    %c0_i32 = arith.constant 0 : i32
    %c0_i32_0 = arith.constant 0 : i32
    return %arg0, %c0_i32 : i32, i32
  }
  func.func @transform_1(%arg0: i32) -> (i32, i32) {
    %c0_i32 = arith.constant 0 : i32
    %c0_i32_0 = arith.constant 0 : i32
    %c0_i32_1 = arith.constant 0 : i32
    return %c0_i32, %c0_i32_0 : i32, i32
  }
  func.func @transform_2(%arg0: i32) -> (i32, i32) {
    %c0_i32 = arith.constant 0 : i32
    %c0_i32_0 = arith.constant 0 : i32
    %c0_i32_1 = arith.constant 0 : i32
    return %c0_i32, %c0_i32_0 : i32, i32
  }
  func.func @transform_3(%arg0: i32) -> (i32, i32) {
    %c0_i32 = arith.constant 0 : i32
    %c0_i32_0 = arith.constant 0 : i32
    %c0_i32_1 = arith.constant 0 : i32
    return %c0_i32, %c0_i32_0 : i32, i32
  }
  func.func @transform_4(%arg0: i32) -> (i32, i32) {
    %c0_i32 = arith.constant 0 : i32
    %c0_i32_0 = arith.constant 0 : i32
    %c0_i32_1 = arith.constant 0 : i32
    return %c0_i32, %c0_i32_0 : i32, i32
  }
  func.func @transform_5(%arg0: i32) -> (i32, i32) {
    %c0_i32 = arith.constant 0 : i32
    %c0_i32_0 = arith.constant 0 : i32
    %c0_i32_1 = arith.constant 0 : i32
    return %c0_i32, %c0_i32_0 : i32, i32
  }
  func.func @transform_6(%arg0: i32) -> (i32, i32) {
    %c0_i32 = arith.constant 0 : i32
    %c0_i32_0 = arith.constant 0 : i32
    %c0_i32_1 = arith.constant 0 : i32
    return %c0_i32, %c0_i32_0 : i32, i32
  }
  func.func @transform_7(%arg0: i32) -> (i32, i32) {
    %c0_i32 = arith.constant 0 : i32
    %c0_i32_0 = arith.constant 0 : i32
    return %arg0, %c0_i32 : i32, i32
  }
}

module attributes {stable_mosaic.version = 11 : i64} {
  func.func @mlp_kernel(%arg0: i32, %arg1: memref<16x128xf32, #tpu.memory_space<vmem>>, %arg2: memref<128x128xbf16, #tpu.memory_space<vmem>>, %arg3: memref<1x128xf32, #tpu.memory_space<vmem>>, %arg4: memref<128x128xbf16, #tpu.memory_space<vmem>>, %arg5: memref<1x128xf32, #tpu.memory_space<vmem>>, %arg6: memref<128x128xbf16, #tpu.memory_space<vmem>>, %arg7: memref<1x128xf32, #tpu.memory_space<vmem>>, %arg8: memref<16x128xf32, #tpu.memory_space<vmem>>, %arg9: memref<16x128xf32, #tpu.memory_space<vmem>>, %arg10: memref<16x128xf32, #tpu.memory_space<vmem>>) attributes {dimension_semantics = [#tpu.dimension_semantics<parallel>], iteration_bounds = array<i64: 1>, scalar_prefetch = 0 : i64, scratch_operands = 2 : i64, tpu.core_type = #tpu.core_type<tc>, window_params = [{transform_indices = @transform_0, window_bounds = array<i64: 16, 128>}, {pipeline_mode = #tpu.pipeline_mode<synchronous>, transform_indices = @transform_1, window_bounds = array<i64: 128, 128>}, {pipeline_mode = #tpu.pipeline_mode<synchronous>, transform_indices = @transform_2, window_bounds = array<i64: 1, 128>}, {pipeline_mode = #tpu.pipeline_mode<synchronous>, transform_indices = @transform_3, window_bounds = array<i64: 128, 128>}, {pipeline_mode = #tpu.pipeline_mode<synchronous>, transform_indices = @transform_4, window_bounds = array<i64: 1, 128>}, {pipeline_mode = #tpu.pipeline_mode<synchronous>, transform_indices = @transform_5, window_bounds = array<i64: 128, 128>}, {pipeline_mode = #tpu.pipeline_mode<synchronous>, transform_indices = @transform_6, window_bounds = array<i64: 1, 128>}, {transform_indices = @transform_7, window_bounds = array<i64: 16, 128>}]} {
    %c0 = arith.constant 0 : index
    %c0_0 = arith.constant 0 : index
    %0 = vector.load %arg1[%c0, %c0_0] : memref<16x128xf32, #tpu.memory_space<vmem>>, vector<16x128xf32>
    %1 = arith.truncf %0 : vector<16x128xf32> to vector<16x128xbf16>
    %c0_1 = arith.constant 0 : index
    %c0_2 = arith.constant 0 : index
    %2 = vector.load %arg2[%c0_1, %c0_2] : memref<128x128xbf16, #tpu.memory_space<vmem>>, vector<128x128xbf16>
    %cst = arith.constant dense<0.000000e+00> : vector<16x128xf32>
    %3 = tpu.matmul %1, %2, %cst {dimension_numbers = #tpu.dot_dimension_numbers<[1], [0], [0], [1], [0, 0, 1, 1], [], []>} : vector<16x128xbf16>, vector<128x128xbf16>, vector<16x128xf32> -> vector<16x128xf32>
    %c0_3 = arith.constant 0 : index
    %c0_4 = arith.constant 0 : index
    %4 = vector.load %arg3[%c0_3, %c0_4] : memref<1x128xf32, #tpu.memory_space<vmem>>, vector<1x128xf32>
    %5 = vector.broadcast %4 : vector<1x128xf32> to vector<16x128xf32>
    %6 = arith.addf %3, %5 : vector<16x128xf32>
    %cst_5 = arith.constant 0.000000e+00 : f32
    %7 = vector.broadcast %cst_5 : f32 to vector<16x128xf32>
    %8 = arith.maximumf %6, %7 : vector<16x128xf32>
    %c0_6 = arith.constant 0 : index
    %c0_7 = arith.constant 0 : index
    %9 = vector.load %arg9[%c0_6, %c0_7] : memref<16x128xf32, #tpu.memory_space<vmem>>, vector<16x128xf32>
    tpu.vector_store %arg9[%c0_6, %c0_7], %8 {strides = array<i32>} : memref<16x128xf32, #tpu.memory_space<vmem>>, vector<16x128xf32>,
    %c0_8 = arith.constant 0 : index
    %c0_9 = arith.constant 0 : index
    %10 = vector.load %arg9[%c0_8, %c0_9] : memref<16x128xf32, #tpu.memory_space<vmem>>, vector<16x128xf32>
    %11 = arith.truncf %10 : vector<16x128xf32> to vector<16x128xbf16>
    %c0_10 = arith.constant 0 : index
    %c0_11 = arith.constant 0 : index
    %12 = vector.load %arg4[%c0_10, %c0_11] : memref<128x128xbf16, #tpu.memory_space<vmem>>, vector<128x128xbf16>
    %cst_12 = arith.constant dense<0.000000e+00> : vector<16x128xf32>
    %13 = tpu.matmul %11, %12, %cst_12 {dimension_numbers = #tpu.dot_dimension_numbers<[1], [0], [0], [1], [0, 0, 1, 1], [], []>} : vector<16x128xbf16>, vector<128x128xbf16>, vector<16x128xf32> -> vector<16x128xf32>
    %c0_13 = arith.constant 0 : index
    %c0_14 = arith.constant 0 : index
    %14 = vector.load %arg5[%c0_13, %c0_14] : memref<1x128xf32, #tpu.memory_space<vmem>>, vector<1x128xf32>
    %15 = vector.broadcast %14 : vector<1x128xf32> to vector<16x128xf32>
    %16 = arith.addf %13, %15 : vector<16x128xf32>
    %cst_15 = arith.constant 0.000000e+00 : f32
    %17 = vector.broadcast %cst_15 : f32 to vector<16x128xf32>
    %18 = arith.maximumf %16, %17 : vector<16x128xf32>
    %c0_16 = arith.constant 0 : index
    %c0_17 = arith.constant 0 : index
    %19 = vector.load %arg10[%c0_16, %c0_17] : memref<16x128xf32, #tpu.memory_space<vmem>>, vector<16x128xf32>
    tpu.vector_store %arg10[%c0_16, %c0_17], %18 {strides = array<i32>} : memref<16x128xf32, #tpu.memory_space<vmem>>, vector<16x128xf32>,
    %c0_18 = arith.constant 0 : index
    %c0_19 = arith.constant 0 : index
    %20 = vector.load %arg10[%c0_18, %c0_19] : memref<16x128xf32, #tpu.memory_space<vmem>>, vector<16x128xf32>
    %21 = arith.truncf %20 : vector<16x128xf32> to vector<16x128xbf16>
    %c0_20 = arith.constant 0 : index
    %c0_21 = arith.constant 0 : index
    %22 = vector.load %arg6[%c0_20, %c0_21] : memref<128x128xbf16, #tpu.memory_space<vmem>>, vector<128x128xbf16>
    %cst_22 = arith.constant dense<0.000000e+00> : vector<16x128xf32>
    %23 = tpu.matmul %21, %22, %cst_22 {dimension_numbers = #tpu.dot_dimension_numbers<[1], [0], [0], [1], [0, 0, 1, 1], [], []>} : vector<16x128xbf16>, vector<128x128xbf16>, vector<16x128xf32> -> vector<16x128xf32>
    %c0_23 = arith.constant 0 : index
    %c0_24 = arith.constant 0 : index
    %24 = vector.load %arg7[%c0_23, %c0_24] : memref<1x128xf32, #tpu.memory_space<vmem>>, vector<1x128xf32>
    %25 = vector.broadcast %24 : vector<1x128xf32> to vector<16x128xf32>
    %26 = arith.addf %23, %25 : vector<16x128xf32>
    %c0_25 = arith.constant 0 : index
    %c0_26 = arith.constant 0 : index
    %27 = vector.load %arg8[%c0_25, %c0_26] : memref<16x128xf32, #tpu.memory_space<vmem>>, vector<16x128xf32>
    tpu.vector_store %arg8[%c0_25, %c0_26], %26 {strides = array<i32>} : memref<16x128xf32, #tpu.memory_space<vmem>>, vector<16x128xf32>,
    return
  }
  func.func @transform_0(%arg0: i32) -> (i32, i32) {
    %c0_i32 = arith.constant 0 : i32
    %c0_i32_0 = arith.constant 0 : i32
    return %arg0, %c0_i32 : i32, i32
  }
  func.func @transform_1(%arg0: i32) -> (i32, i32) {
    %c0_i32 = arith.constant 0 : i32
    %c0_i32_0 = arith.constant 0 : i32
    %c0_i32_1 = arith.constant 0 : i32
    return %c0_i32, %c0_i32_0 : i32, i32
  }
  func.func @transform_2(%arg0: i32) -> (i32, i32) {
    %c0_i32 = arith.constant 0 : i32
    %c0_i32_0 = arith.constant 0 : i32
    %c0_i32_1 = arith.constant 0 : i32
    return %c0_i32, %c0_i32_0 : i32, i32
  }
  func.func @transform_3(%arg0: i32) -> (i32, i32) {
    %c0_i32 = arith.constant 0 : i32
    %c0_i32_0 = arith.constant 0 : i32
    %c0_i32_1 = arith.constant 0 : i32
    return %c0_i32, %c0_i32_0 : i32, i32
  }
  func.func @transform_4(%arg0: i32) -> (i32, i32) {
    %c0_i32 = arith.constant 0 : i32
    %c0_i32_0 = arith.constant 0 : i32
    %c0_i32_1 = arith.constant 0 : i32
    return %c0_i32, %c0_i32_0 : i32, i32
  }
  func.func @transform_5(%arg0: i32) -> (i32, i32) {
    %c0_i32 = arith.constant 0 : i32
    %c0_i32_0 = arith.constant 0 : i32
    %c0_i32_1 = arith.constant 0 : i32
    return %c0_i32, %c0_i32_0 : i32, i32
  }
  func.func @transform_6(%arg0: i32) -> (i32, i32) {
    %c0_i32 = arith.constant 0 : i32
    %c0_i32_0 = arith.constant 0 : i32
    %c0_i32_1 = arith.constant 0 : i32
    return %c0_i32, %c0_i32_0 : i32, i32
  }
  func.func @transform_7(%arg0: i32) -> (i32, i32) {
    %c0_i32 = arith.constant 0 : i32
    %c0_i32_0 = arith.constant 0 : i32
    return %arg0, %c0_i32 : i32, i32
  }
}

</mosaic_0001>

<bundles_post_ra>
// kernel: tpu_custom_call.1
= control target key start
LH: loop header
LB: loop body
LE: loop exit
PB: predicated region body
PF: predicated region fallthrough
CT: control target
= control target key end

     0   :  { %12 = vsyncpa [#allocation5], 0  ;;  %s715_s0 = inlined_call_operand.hbm [shape: f32[16,128], index: 0, kind: input, shape index: {}]   ;;  %s716_s1 = inlined_call_operand.hbm [shape: bf16[128,128], index: 1, kind: input, shape index: {}]   ;;  %s717_s2 = inlined_call_operand.vmem [shape: f32[1,128], index: 2, kind: input, shape index: {}]   ;;  %s718_s3 = inlined_call_operand.hbm [shape: bf16[128,128], index: 3, kind: input, shape index: {}]   ;;  %s719_s4 = inlined_call_operand.vmem [shape: f32[1,128], index: 4, kind: input, shape index: {}]   ;;  %s720_s5 = inlined_call_operand.hbm [shape: bf16[128,128], index: 5, kind: input, shape index: {}]   ;;  %s721_s6 = inlined_call_operand.vmem [shape: f32[1,128], index: 6, kind: input, shape index: {}]   ;;  %s722_s7 = inlined_call_operand.hbm [shape: f32[16,128], index: 7, kind: output, shape index: {}]  }
   0x1   :  { %13 = vsyncpa [#allocation8], 0 }
   0x2   :  { %14 = vsyncpa [#allocation11], 0  ;;  %s33_s26 = sshll.u32 %s716_s1, 4  ;;  %s34_s26 = int_to_ptr.hbm [resolvable:$true] %s33_s26 }
   0x3   :  { %15 = vsyncpa [#allocation6], 0  ;;  %s636_s27 = smov [#allocation7]   ;;  %s20_s8 = sshll.u32 %s715_s0, 4  ;;  %s21_s8 = int_to_ptr.hbm [resolvable:$true] %s20_s8 }
   0x4   :  { %s35_s28 = sshll.u32 %s636_s27, 4  ;;  %s637_s9 = smov 64   ;;  %s36_s28 = int_to_ptr.vmem [resolvable:$true] %s35_s28 }
   0x5   :  { %s638_s10 = smov 4   ;;  %s639_s11 = smov [#allocation4]  }
   0x6   :  { %41 = dma.hbm_to_vmem [thread:$0]  %s34_s26, 1024, %s36_s28, [#allocation8], %s637_s9, %s637_s9, %s638_s10  }
   0x7   :  { %s22_s12 = sshll.u32 %s639_s11, 4  ;;  %s640_s13 = smov 128   ;;  %s23_s12 = int_to_ptr.vmem [resolvable:$true] %s22_s12 }
   0x8   :  { %s641_s14 = smov 8   ;;  %s48_s16 = sshll.u32 %s718_s3, 4  ;;  %s49_s16 = int_to_ptr.hbm [resolvable:$true] %s48_s16 }
   0x9   :  { %28 = dma.hbm_to_vmem [thread:$0]  %s21_s8, 256, %s23_s12, [#allocation5], %s640_s13, %s640_s13, %s641_s14  }
   0xa   :  { %s642_s17 = smov [#allocation9]   ;;  %s63_s20 = sshll.u32 %s720_s5, 4  ;;  %s64_s20 = int_to_ptr.hbm [resolvable:$true] %s63_s20 }
   0xb   :  { %s50_s0 = sshll.u32 %s642_s17, 4  ;;  %s643_s21 = smov [#allocation10]   ;;  %s51_s0 = int_to_ptr.vmem [resolvable:$true] %s50_s0 }
   0xc   :  { %56 = dma.hbm_to_vmem [thread:$0]  %s49_s16, 1024, %s51_s0, [#allocation8], %s637_s9, %s637_s9, %s638_s10  }
   0xd   :  { %s65_s22 = sshll.u32 %s643_s21, 4  ;;  %s66_s22 = int_to_ptr.vmem [resolvable:$true] %s65_s22 }
   0xe   :  { %71 = dma.hbm_to_vmem [thread:$0]  %s64_s20, 1024, %s66_s22, [#allocation11], %s637_s9, %s637_s9, %s638_s10  }
   0xf   :  { %628 = dma.done.wait [#allocation5], 256  }
  0x10   :  { %629 = vsyncadd [#allocation5], 4294967040 }
  0x11   :  { %630 = dma.done.wait [#allocation8], 2048  }
  0x12   :  { %631 = vsyncadd [#allocation8], 4294965248 }
  0x13   :  { %632 = dma.done.wait [#allocation11], 1024  }
  0x14   :  { %633 = vsyncadd [#allocation11], 4294966272  ;;  %v479_v0 = vld [vmem:[#allocation7 + $0x38] sm:$0xff]  ;;  %v478_v1 = vld [vmem:[#allocation7 + $0x30] sm:$0xff]  ;;  %s644_s26 = smov [#allocation12]  }
  0x15   :  { %161 = vmatpush.bf16.msra.mxu0 %v479_v0  ;;  %v487_v2 = vld [vmem:[#allocation9 + $0x38] sm:$0xff]  ;;  %v486_v3 = vld [vmem:[#allocation9 + $0x30] sm:$0xff]  ;;  %v477_v4 = vld [vmem:[#allocation7 + $0x28] sm:$0xff]  ;;  %s359_s27 = sshll.u32 %s644_s26, 4  ;;  %s360_s27 = int_to_ptr.vmem [resolvable:$true] %s359_s27 }
  0x16   :  { %250 = vmatpush.bf16.msra.mxu1 %v487_v2  ;;  %v485_v5 = vld [vmem:[#allocation9 + $0x28] sm:$0xff]  ;;  %v476_v6 = vld [vmem:[#allocation7 + $0x20] sm:$0xff]  ;;  %v475_v8 = vld [vmem:[#allocation7 + $0x18] sm:$0xff] }
  0x17   :  { %v484_v7 = vld [vmem:[#allocation9 + $0x20] sm:$0xff]  ;;  %v474_v9 = vld [vmem:[#allocation7 + $0x10] sm:$0xff]  ;;  %v473_v10 = vld [vmem:[#allocation7 + $0x8] sm:$0xff] }
  0x18   :  { %v472_v11 = vld [vmem:[#allocation7] sm:$0xff]  ;;  %v90_v12 = vld [vmem:[#allocation4] sm:$0xff]  ;;  %v91_v13 = vld [vmem:[#allocation4 + $0x8] sm:$0xff] }
  0x19   :  { %162 = vmatpush.bf16.msra.mxu0 %v478_v1  ;;  %v92_v14 = vpack.c.bf16 %v91_v13, %v90_v12  ;;  %v483_v15 = vld [vmem:[#allocation9 + $0x18] sm:$0xff]  ;;  %v482_v16 = vld [vmem:[#allocation9 + $0x10] sm:$0xff]  ;;  %v481_v17 = vld [vmem:[#allocation9 + $0x8] sm:$0xff] }
  0x1a   :  { %251 = vmatpush.bf16.msra.mxu1 %v486_v3  ;;  %v480_v18 = vld [vmem:[#allocation9] sm:$0xff]  ;;  %v495_v19 = vld [vmem:[#allocation10 + $0x38] sm:$0xff]  ;;  %v494_v20 = vld [vmem:[#allocation10 + $0x30] sm:$0xff] }
  0x1b   :  { %339 = vmatpush.bf16.msra.mxu2 %v495_v19  ;;  %v493_v21 = vld [vmem:[#allocation10 + $0x28] sm:$0xff]  ;;  %v492_v22 = vld [vmem:[#allocation10 + $0x20] sm:$0xff]  ;;  %v505_v24 = vld [vmem:[%s717_s2] ss:$0 sm:$0xff] }
  0x1c   :  { %v491_v31 = vld [vmem:[#allocation10 + $0x18] sm:$0xff]  ;;  %v490_v32 = vld [vmem:[#allocation10 + $0x10] sm:$0xff]  ;;  %v489_v33 = vld [vmem:[#allocation10 + $0x8] sm:$0xff] }
  0x1d   :  { %163 = vmatpush.bf16.msra.mxu0 %v477_v4  ;;  %v488_v34 = vld [vmem:[#allocation10] sm:$0xff]  ;;  %v506_v36 = vld [vmem:[%s719_s4] ss:$0 sm:$0xff]  ;;  %s361_s4 = sshll.u32 %s722_s7, 4  ;;  %s362_s4 = int_to_ptr.hbm [resolvable:$true] %s361_s4 }
  0x1e   :  { %252 = vmatpush.bf16.msra.mxu1 %v485_v5  ;;  %v507_v43 = vld [vmem:[%s721_s6] ss:$0 sm:$0xff] }
  0x1f   :  { %340 = vmatpush.bf16.msra.mxu2 %v494_v20 }
  0x21   :  { %164 = vmatpush.bf16.msra.mxu0 %v476_v6 }
  0x22   :  { %253 = vmatpush.bf16.msra.mxu1 %v484_v7 }
  0x23   :  { %341 = vmatpush.bf16.msra.mxu2 %v493_v21 }
  0x25   :  { %165 = vmatpush.bf16.msra.mxu0 %v475_v8 }
  0x26   :  { %254 = vmatpush.bf16.msra.mxu1 %v483_v15 }
  0x27   :  { %342 = vmatpush.bf16.msra.mxu2 %v492_v22 }
  0x29   :  { %166 = vmatpush.bf16.msra.mxu0 %v474_v9 }
  0x2a   :  { %255 = vmatpush.bf16.msra.mxu1 %v482_v16 }
  0x2b   :  { %343 = vmatpush.bf16.msra.mxu2 %v491_v31 }
  0x2d   :  { %167 = vmatpush.bf16.msra.mxu0 %v473_v10 }
  0x2e   :  { %256 = vmatpush.bf16.msra.mxu1 %v481_v17 }
  0x2f   :  { %344 = vmatpush.bf16.msra.mxu2 %v490_v32 }
  0x31   :  { %168 = vmatpush.bf16.msra.mxu0 %v472_v11 }
  0x32   :  { %257 = vmatpush.bf16.msra.mxu1 %v480_v18 }
  0x33   :  { %345 = vmatpush.bf16.msra.mxu2 %v489_v33 }
  0x34   :  { %169 = vmatmul.bf16.vlgmr.msra.gmra.mxu0 %v92_v14 }
  0x37   :  { %346 = vmatpush.bf16.msra.mxu2 %v488_v34 }
  0xb1   :  { %v170_v23 = vpop.f32.mrf.mxu0 }
  0xb2   :  { %v171_v25 = vadd.f32 %v505_v24, %v170_v23 }
  0xb4   :  { %v175_v28 = vmax.f32 %v171_v25, 0.0 }
  0xb9   :  { %v172_v26 = vpop.f32.mrf.mxu0 }
  0xba   :  { %v173_v27 = vadd.f32 %v505_v24, %v172_v26 }
  0xbc   :  { %v176_v29 = vmax.f32 %v173_v27, 0.0 }
  0xbe   :  { %v181_v30 = vpack.c.bf16 %v176_v29, %v175_v28 }
  0xc0   :  { %258 = vmatmul.bf16.vlgmr.msra.gmra.mxu1 %v181_v30 }
 0x13d   :  { %v259_v35 = vpop.f32.mrf.mxu1 }
 0x13e   :  { %v260_v37 = vadd.f32 %v506_v36, %v259_v35 }
 0x140   :  { %v264_v40 = vmax.f32 %v260_v37, 0.0 }
 0x145   :  { %v261_v38 = vpop.f32.mrf.mxu1 }
 0x146   :  { %v262_v39 = vadd.f32 %v506_v36, %v261_v38 }
 0x148   :  { %v265_v41 = vmax.f32 %v262_v39, 0.0 }
 0x14a   :  { %v270_v42 = vpack.c.bf16 %v265_v41, %v264_v40 }
 0x14c   :  { %347 = vmatmul.bf16.vlgmr.msra.gmra.mxu2 %v270_v42 }
 0x1cf   :  { %v348_v44 = vpop.f32.mrf.mxu2 }
 0x1d0   :  { %v349_v45 = vadd.f32 %v507_v43, %v348_v44 }
 0x1d2   :  { %353 = vst [vmem:[#allocation12] sm:$0xff] %v349_v45 }
 0x1d7   :  { %v350_v46 = vpop.f32.mrf.mxu2 }
 0x1d8   :  { %v351_v47 = vadd.f32 %v507_v43, %v350_v46 }
 0x1da   :  { %354 = vst [vmem:[#allocation12 + $0x8] sm:$0xff] %v351_v47 }
 0x1db   :  { %367 = dma.vmem_to_hbm [thread:$0]  %s360_s27, 256, %s362_s4, [#allocation6], %s640_s13, %s640_s13, %s641_s14  }
 0x1dc   :  { %634 = dma.done.wait [#allocation6], 256  }
 0x1dd   :  { %635 = vsyncadd [#allocation6], 4294967040 }
 0x1de   :  { %372 = vsyncpa [#allocation5], 1 }
 0x1df   :  { %373 = vsyncpa [#allocation8], 1 }
 0x1e0   :  { %374 = vsyncpa [#allocation11], 1 }
 0x1e1   :  { %375 = vsyncpa [#allocation6], 1 }

// kernel: tpu_custom_call.1
= control target key start
LH: loop header
LB: loop body
LE: loop exit
PB: predicated region body
PF: predicated region fallthrough
CT: control target
= control target key end

     0   :  { %12 = vsyncpa [#allocation5], 0  ;;  %s715_s0 = inlined_call_operand.hbm [shape: f32[16,128], index: 0, kind: input, shape index: {}]   ;;  %s716_s1 = inlined_call_operand.hbm [shape: bf16[128,128], index: 1, kind: input, shape index: {}]   ;;  %s717_s2 = inlined_call_operand.vmem [shape: f32[1,128], index: 2, kind: input, shape index: {}]   ;;  %s718_s3 = inlined_call_operand.hbm [shape: bf16[128,128], index: 3, kind: input, shape index: {}]   ;;  %s719_s4 = inlined_call_operand.vmem [shape: f32[1,128], index: 4, kind: input, shape index: {}]   ;;  %s720_s5 = inlined_call_operand.hbm [shape: bf16[128,128], index: 5, kind: input, shape index: {}]   ;;  %s721_s6 = inlined_call_operand.vmem [shape: f32[1,128], index: 6, kind: input, shape index: {}]   ;;  %s722_s7 = inlined_call_operand.hbm [shape: f32[16,128], index: 7, kind: output, shape index: {}]  }
   0x1   :  { %13 = vsyncpa [#allocation8], 0 }
   0x2   :  { %14 = vsyncpa [#allocation11], 0  ;;  %s33_s26 = sshll.u32 %s716_s1, 4  ;;  %s34_s26 = int_to_ptr.hbm [resolvable:$true] %s33_s26 }
   0x3   :  { %15 = vsyncpa [#allocation6], 0  ;;  %s636_s27 = smov [#allocation7]   ;;  %s20_s8 = sshll.u32 %s715_s0, 4  ;;  %s21_s8 = int_to_ptr.hbm [resolvable:$true] %s20_s8 }
   0x4   :  { %s35_s28 = sshll.u32 %s636_s27, 4  ;;  %s637_s9 = smov 64   ;;  %s36_s28 = int_to_ptr.vmem [resolvable:$true] %s35_s28 }
   0x5   :  { %s638_s10 = smov 4   ;;  %s639_s11 = smov [#allocation4]  }
   0x6   :  { %41 = dma.hbm_to_vmem [thread:$0]  %s34_s26, 1024, %s36_s28, [#allocation8], %s637_s9, %s637_s9, %s638_s10  }
   0x7   :  { %s22_s12 = sshll.u32 %s639_s11, 4  ;;  %s640_s13 = smov 128   ;;  %s23_s12 = int_to_ptr.vmem [resolvable:$true] %s22_s12 }
   0x8   :  { %s641_s14 = smov 8   ;;  %s48_s16 = sshll.u32 %s718_s3, 4  ;;  %s49_s16 = int_to_ptr.hbm [resolvable:$true] %s48_s16 }
   0x9   :  { %28 = dma.hbm_to_vmem [thread:$0]  %s21_s8, 256, %s23_s12, [#allocation5], %s640_s13, %s640_s13, %s641_s14  }
   0xa   :  { %s642_s17 = smov [#allocation9]   ;;  %s63_s20 = sshll.u32 %s720_s5, 4  ;;  %s64_s20 = int_to_ptr.hbm [resolvable:$true] %s63_s20 }
   0xb   :  { %s50_s0 = sshll.u32 %s642_s17, 4  ;;  %s643_s21 = smov [#allocation10]   ;;  %s51_s0 = int_to_ptr.vmem [resolvable:$true] %s50_s0 }
   0xc   :  { %56 = dma.hbm_to_vmem [thread:$0]  %s49_s16, 1024, %s51_s0, [#allocation8], %s637_s9, %s637_s9, %s638_s10  }
   0xd   :  { %s65_s22 = sshll.u32 %s643_s21, 4  ;;  %s66_s22 = int_to_ptr.vmem [resolvable:$true] %s65_s22 }
   0xe   :  { %71 = dma.hbm_to_vmem [thread:$0]  %s64_s20, 1024, %s66_s22, [#allocation11], %s637_s9, %s637_s9, %s638_s10  }
   0xf   :  { %628 = dma.done.wait [#allocation5], 256  }
  0x10   :  { %629 = vsyncadd [#allocation5], 4294967040 }
  0x11   :  { %630 = dma.done.wait [#allocation8], 2048  }
  0x12   :  { %631 = vsyncadd [#allocation8], 4294965248 }
  0x13   :  { %632 = dma.done.wait [#allocation11], 1024  }
  0x14   :  { %633 = vsyncadd [#allocation11], 4294966272  ;;  %v479_v0 = vld [vmem:[#allocation7 + $0x38] sm:$0xff]  ;;  %v478_v1 = vld [vmem:[#allocation7 + $0x30] sm:$0xff]  ;;  %s644_s26 = smov [#allocation12]  }
  0x15   :  { %161 = vmatpush.bf16.msra.mxu0 %v479_v0  ;;  %v487_v2 = vld [vmem:[#allocation9 + $0x38] sm:$0xff]  ;;  %v486_v3 = vld [vmem:[#allocation9 + $0x30] sm:$0xff]  ;;  %v477_v4 = vld [vmem:[#allocation7 + $0x28] sm:$0xff]  ;;  %s359_s27 = sshll.u32 %s644_s26, 4  ;;  %s360_s27 = int_to_ptr.vmem [resolvable:$true] %s359_s27 }
  0x16   :  { %250 = vmatpush.bf16.msra.mxu1 %v487_v2  ;;  %v485_v5 = vld [vmem:[#allocation9 + $0x28] sm:$0xff]  ;;  %v476_v6 = vld [vmem:[#allocation7 + $0x20] sm:$0xff]  ;;  %v475_v8 = vld [vmem:[#allocation7 + $0x18] sm:$0xff] }
  0x17   :  { %v484_v7 = vld [vmem:[#allocation9 + $0x20] sm:$0xff]  ;;  %v474_v9 = vld [vmem:[#allocation7 + $0x10] sm:$0xff]  ;;  %v473_v10 = vld [vmem:[#allocation7 + $0x8] sm:$0xff] }
  0x18   :  { %v472_v11 = vld [vmem:[#allocation7] sm:$0xff]  ;;  %v90_v12 = vld [vmem:[#allocation4] sm:$0xff]  ;;  %v91_v13 = vld [vmem:[#allocation4 + $0x8] sm:$0xff] }
  0x19   :  { %162 = vmatpush.bf16.msra.mxu0 %v478_v1  ;;  %v92_v14 = vpack.c.bf16 %v91_v13, %v90_v12  ;;  %v483_v15 = vld [vmem:[#allocation9 + $0x18] sm:$0xff]  ;;  %v482_v16 = vld [vmem:[#allocation9 + $0x10] sm:$0xff]  ;;  %v481_v17 = vld [vmem:[#allocation9 + $0x8] sm:$0xff] }
  0x1a   :  { %251 = vmatpush.bf16.msra.mxu1 %v486_v3  ;;  %v480_v18 = vld [vmem:[#allocation9] sm:$0xff]  ;;  %v495_v19 = vld [vmem:[#allocation10 + $0x38] sm:$0xff]  ;;  %v494_v20 = vld [vmem:[#allocation10 + $0x30] sm:$0xff] }
  0x1b   :  { %339 = vmatpush.bf16.msra.mxu2 %v495_v19  ;;  %v493_v21 = vld [vmem:[#allocation10 + $0x28] sm:$0xff]  ;;  %v492_v22 = vld [vmem:[#allocation10 + $0x20] sm:$0xff]  ;;  %v505_v24 = vld [vmem:[%s717_s2] ss:$0 sm:$0xff] }
  0x1c   :  { %v491_v31 = vld [vmem:[#allocation10 + $0x18] sm:$0xff]  ;;  %v490_v32 = vld [vmem:[#allocation10 + $0x10] sm:$0xff]  ;;  %v489_v33 = vld [vmem:[#allocation10 + $0x8] sm:$0xff] }
  0x1d   :  { %163 = vmatpush.bf16.msra.mxu0 %v477_v4  ;;  %v488_v34 = vld [vmem:[#allocation10] sm:$0xff]  ;;  %v506_v36 = vld [vmem:[%s719_s4] ss:$0 sm:$0xff]  ;;  %s361_s4 = sshll.u32 %s722_s7, 4  ;;  %s362_s4 = int_to_ptr.hbm [resolvable:$true] %s361_s4 }
  0x1e   :  { %252 = vmatpush.bf16.msra.mxu1 %v485_v5  ;;  %v507_v43 = vld [vmem:[%s721_s6] ss:$0 sm:$0xff] }
  0x1f   :  { %340 = vmatpush.bf16.msra.mxu2 %v494_v20 }
  0x21   :  { %164 = vmatpush.bf16.msra.mxu0 %v476_v6 }
  0x22   :  { %253 = vmatpush.bf16.msra.mxu1 %v484_v7 }
  0x23   :  { %341 = vmatpush.bf16.msra.mxu2 %v493_v21 }
  0x25   :  { %165 = vmatpush.bf16.msra.mxu0 %v475_v8 }
  0x26   :  { %254 = vmatpush.bf16.msra.mxu1 %v483_v15 }
  0x27   :  { %342 = vmatpush.bf16.msra.mxu2 %v492_v22 }
  0x29   :  { %166 = vmatpush.bf16.msra.mxu0 %v474_v9 }
  0x2a   :  { %255 = vmatpush.bf16.msra.mxu1 %v482_v16 }
  0x2b   :  { %343 = vmatpush.bf16.msra.mxu2 %v491_v31 }
  0x2d   :  { %167 = vmatpush.bf16.msra.mxu0 %v473_v10 }
  0x2e   :  { %256 = vmatpush.bf16.msra.mxu1 %v481_v17 }
  0x2f   :  { %344 = vmatpush.bf16.msra.mxu2 %v490_v32 }
  0x31   :  { %168 = vmatpush.bf16.msra.mxu0 %v472_v11 }
  0x32   :  { %257 = vmatpush.bf16.msra.mxu1 %v480_v18 }
  0x33   :  { %345 = vmatpush.bf16.msra.mxu2 %v489_v33 }
  0x34   :  { %169 = vmatmul.bf16.vlgmr.msra.gmra.mxu0 %v92_v14 }
  0x37   :  { %346 = vmatpush.bf16.msra.mxu2 %v488_v34 }
  0xb1   :  { %v170_v23 = vpop.f32.mrf.mxu0 }
  0xb2   :  { %v171_v25 = vadd.f32 %v505_v24, %v170_v23 }
  0xb4   :  { %v175_v28 = vmax.f32 %v171_v25, 0.0 }
  0xb9   :  { %v172_v26 = vpop.f32.mrf.mxu0 }
  0xba   :  { %v173_v27 = vadd.f32 %v505_v24, %v172_v26 }
  0xbc   :  { %v176_v29 = vmax.f32 %v173_v27, 0.0 }
  0xbe   :  { %v181_v30 = vpack.c.bf16 %v176_v29, %v175_v28 }
  0xc0   :  { %258 = vmatmul.bf16.vlgmr.msra.gmra.mxu1 %v181_v30 }
 0x13d   :  { %v259_v35 = vpop.f32.mrf.mxu1 }
 0x13e   :  { %v260_v37 = vadd.f32 %v506_v36, %v259_v35 }
 0x140   :  { %v264_v40 = vmax.f32 %v260_v37, 0.0 }
 0x145   :  { %v261_v38 = vpop.f32.mrf.mxu1 }
 0x146   :  { %v262_v39 = vadd.f32 %v506_v36, %v261_v38 }
 0x148   :  { %v265_v41 = vmax.f32 %v262_v39, 0.0 }
 0x14a   :  { %v270_v42 = vpack.c.bf16 %v265_v41, %v264_v40 }
 0x14c   :  { %347 = vmatmul.bf16.vlgmr.msra.gmra.mxu2 %v270_v42 }
 0x1cf   :  { %v348_v44 = vpop.f32.mrf.mxu2 }
 0x1d0   :  { %v349_v45 = vadd.f32 %v507_v43, %v348_v44 }
 0x1d2   :  { %353 = vst [vmem:[#allocation12] sm:$0xff] %v349_v45 }
 0x1d7   :  { %v350_v46 = vpop.f32.mrf.mxu2 }
 0x1d8   :  { %v351_v47 = vadd.f32 %v507_v43, %v350_v46 }
 0x1da   :  { %354 = vst [vmem:[#allocation12 + $0x8] sm:$0xff] %v351_v47 }
 0x1db   :  { %367 = dma.vmem_to_hbm [thread:$0]  %s360_s27, 256, %s362_s4, [#allocation6], %s640_s13, %s640_s13, %s641_s14  }
 0x1dc   :  { %634 = dma.done.wait [#allocation6], 256  }
 0x1dd   :  { %635 = vsyncadd [#allocation6], 4294967040 }
 0x1de   :  { %372 = vsyncpa [#allocation5], 1 }
 0x1df   :  { %373 = vsyncpa [#allocation8], 1 }
 0x1e0   :  { %374 = vsyncpa [#allocation11], 1 }
 0x1e1   :  { %375 = vsyncpa [#allocation6], 1 }

</bundles_post_ra>
